<compile_context>
chip_gen: v7x
topology: tpu7x:2x2x1
jax: 0.10.0
libtpu: 0.0.40
codegen_flags: <defaults>
</compile_context>

<pallas_src>
import numpy as np
import jax
import jax.numpy as jnp
from jax.experimental import pallas as pl
from jax.experimental.pallas import tpu as pltpu

EPS = 1e-5
NEG_SLOPE = 0.01
K1, P1 = 11, 5
K2, P2 = 7, 3
LANE = 128
HALO = 8   # sublane-aligned zero halo (>= max(P1, P2), multiple of 8)


def _round_up(x, m):
    return (x + m - 1) // m * m


def _vmem_limit_bytes():
    """Raise the scoped-VMEM limit above the small default while leaving
    headroom and respecting v7x's 64 MiB physical VMEM (128 MiB on v5e/v6e)."""
    try:
        cap = int(pltpu.get_tpu_info().vmem_capacity_bytes)
    except Exception:
        cap = 64 * 1024 * 1024
    return min(cap * 7 // 8, 112 * 1024 * 1024)


def _zero_halos(pad_ref, l):
    """Zero only the halo rows of the padded VMEM scratch (body rows are fully
    overwritten every grid step).  Re-done each step so it stays correct when
    the batch grid axis is sharded across TensorCores."""
    z = jnp.zeros((HALO, pad_ref.shape[1]), jnp.float32)
    pad_ref[:HALO, :] = z
    pad_ref[HALO + l:HALO + l + HALO, :] = z


def conv1_kernel(x1_ref, x2_ref, ut_ref, w1a_ref, w1b_ref,
                 y1_ref, s1_ref, q1_ref, x2pad_ref, x1pad_ref):
    """Per-batch: upsample x1 (one matmul), conv1(k=11) over cat([x2, x1_up])
    via split weights + K1 accumulated per-tap matmuls; emits pre-BN y1 and
    per-batch BN sum / sum-of-squares partials."""
    l2 = x2_ref.shape[1]
    c_mid = w1a_ref.shape[2]

    # 1) linear upsample (scale=2, align_corners=True) + F.pad folded into one
    #    unbatched (L2, L1) @ (L1, C1) matmul; U stays VMEM-resident across the
    #    whole grid (constant block index), no per-batch broadcast.
    x1_up = jnp.dot(ut_ref[...], x1_ref[0], preferred_element_type=jnp.float32)

    # 2) zero-padded activations in VMEM scratch, body stored sublane-aligned.
    _zero_halos(x2pad_ref, l2)
    _zero_halos(x1pad_ref, l2)
    x2pad_ref[HALO:HALO + l2, :] = x2_ref[0]
    x1pad_ref[HALO:HALO + l2, :] = x1_up

    # 3) conv1: the channel concat is eliminated by splitting w1 along Cin;
    #    each tap is one small matmul accumulated into an f32 value.
    off = HALO - P1
    acc = jnp.zeros((l2, c_mid), jnp.float32)
    for t in range(K1):
        acc += jnp.dot(x2pad_ref[off + t:off + t + l2, :], w1a_ref[t],
                       preferred_element_type=jnp.float32)
        acc += jnp.dot(x1pad_ref[off + t:off + t + l2, :], w1b_ref[t],
                       preferred_element_type=jnp.float32)

    y1_ref[...] = acc[None]
    s1_ref[...] = jnp.sum(acc, axis=0, keepdims=True)[None]
    q1_ref[...] = jnp.sum(acc * acc, axis=0, keepdims=True)[None]


def conv2_kernel(y1_ref, sc1_ref, sh1_ref, w2_ref,
                 y2_ref, s2_ref, q2_ref, y1pad_ref):
    """Per-batch: BN1 apply (folded scale/shift) + LeakyReLU + conv2(k=7) via
    K2 accumulated per-tap matmuls over the real c_mid channels; emits pre-BN
    y2 (output channels padded to 128 lanes) and per-batch BN partials."""
    l2 = y1_ref.shape[1]
    c_out_p = w2_ref.shape[2]

    z = y1_ref[0] * sc1_ref[...] + sh1_ref[...]
    a = jnp.where(z > 0, z, NEG_SLOPE * z)

    _zero_halos(y1pad_ref, l2)
    y1pad_ref[HALO:HALO + l2, :] = a

    off = HALO - P2
    acc = jnp.zeros((l2, c_out_p), jnp.float32)
    for t in range(K2):
        acc += jnp.dot(y1pad_ref[off + t:off + t + l2, :], w2_ref[t],
                       preferred_element_type=jnp.float32)

    y2_ref[...] = acc[None]
    s2_ref[...] = jnp.sum(acc, axis=0, keepdims=True)[None]
    q2_ref[...] = jnp.sum(acc * acc, axis=0, keepdims=True)[None]


def bn_act_kernel(y2_ref, sc2_ref, sh2_ref, out_ref):
    """Per-batch: BN2 apply + LeakyReLU; 128-lane-dense unmasked stores."""
    z = y2_ref[0] * sc2_ref[...] + sh2_ref[...]
    out_ref[...] = jnp.where(z > 0, z, NEG_SLOPE * z)[None]


def make_upsample_matrix(l_in, l_target):
    """U of shape (l_in, l_target): linear align_corners x2 upsample + F.pad."""
    l_up = 2 * l_in
    U = np.zeros((l_in, l_up), dtype=np.float32)
    if l_in == 1 or l_up == 1:
        U[0, :] = 1.0
    else:
        scale = (l_in - 1) / (l_up - 1)
        for j in range(l_up):
            src = j * scale
            i0 = min(int(np.floor(src)), l_in - 1)
            i1 = min(i0 + 1, l_in - 1)
            f = src - i0
            U[i0, j] += 1.0 - f
            U[i1, j] += f
    diff = l_target - l_up
    assert diff >= 0, "expected len(x2) >= 2*len(x1) (negative pad crops)"
    pad_left = diff // 2
    Ufull = np.zeros((l_in, l_target), dtype=np.float32)
    Ufull[:, pad_left:pad_left + l_up] = U
    return Ufull


def up_forward(x1, x2, params):
    """x1: (N, C1, L1), x2: (N, C2, L2) in PyTorch NCW; returns (N, C_out, L2)."""
    n, c1, l1 = x1.shape
    _, c2, l2 = x2.shape
    w1, g1, b1, w2, g2, b2 = params
    c_mid, c_in = w1.shape[0], w1.shape[1]
    c_out = w2.shape[0]
    assert c_in == c1 + c2

    # Only the *final* conv output channels are lane-padded to 128 (extra MXU
    # output columns are free and give unmasked 128-lane stores).  The mid
    # channels keep their real width so conv2 contracts over K2*c_mid only.
    c_out_p = _round_up(c_out, LANE)

    ut = jnp.asarray(make_upsample_matrix(l1, l2).T)          # (L2, L1)

    # layout plumbing only: kernels run in (L, C) with channels on lanes.
    x1_nlc = jnp.transpose(x1, (0, 2, 1))                     # (N, L1, C1)
    x2_nlc = jnp.transpose(x2, (0, 2, 1))                     # (N, L2, C2)

    # Per-tap weights, tap-major (K, Cin, Cout); torch.cat([x2, x1]) means the
    # first c2 input channels of w1 act on x2, the rest on the upsampled x1.
    w1a = jnp.transpose(w1[:, :c2, :], (2, 1, 0))             # (K1, C2, c_mid)
    w1b = jnp.transpose(w1[:, c2:, :], (2, 1, 0))             # (K1, C1, c_mid)
    w2t = jnp.pad(jnp.transpose(w2, (2, 1, 0)),               # (K2, c_mid, c_out_p)
                  ((0, 0), (0, 0), (0, c_out_p - c_out)))

    lpad = l2 + 2 * HALO
    vmem_limit = _vmem_limit_bytes()

    def full_spec(arr):
        zeros = (0,) * arr.ndim
        return pl.BlockSpec(arr.shape, lambda b: zeros)

    def batch_spec(tail):
        zeros = (0,) * len(tail)
        return pl.BlockSpec((1,) + tuple(tail), lambda b: (b,) + zeros)

    def cparams():
        return pltpu.CompilerParams(dimension_semantics=("parallel",),
                                    vmem_limit_bytes=vmem_limit)

    # ---- pass 1: upsample + conv1 -> pre-BN y1 + per-batch BN partials ----
    flops1 = 2 * n * l2 * (l1 * c1 + K1 * (c1 + c2) * c_mid)
    bytes1 = 4 * (x1_nlc.size + x2_nlc.size + ut.size + w1a.size + w1b.size
                  + n * l2 * c_mid + 2 * n * c_mid)
    y1_pre, s1, q1 = pl.pallas_call(
        conv1_kernel,
        out_shape=(jax.ShapeDtypeStruct((n, l2, c_mid), jnp.float32),
                   jax.ShapeDtypeStruct((n, 1, c_mid), jnp.float32),
                   jax.ShapeDtypeStruct((n, 1, c_mid), jnp.float32)),
        grid=(n,),
        in_specs=[batch_spec((l1, c1)), batch_spec((l2, c2)),
                  full_spec(ut), full_spec(w1a), full_spec(w1b)],
        out_specs=(batch_spec((l2, c_mid)), batch_spec((1, c_mid)),
                   batch_spec((1, c_mid))),
        scratch_shapes=[pltpu.VMEM((lpad, c2), jnp.float32),
                        pltpu.VMEM((lpad, c1), jnp.float32)],
        compiler_params=cparams(),
        cost_estimate=pl.CostEstimate(flops=flops1, transcendentals=0,
                                      bytes_accessed=bytes1),
    )(x1_nlc, x2_nlc, ut, w1a, w1b)

    # BatchNorm1d (training mode, biased variance) stats are global over
    # (N, L): fold the tiny per-batch partials into scale/shift in JAX.
    cnt = float(n * l2)

    def bn_scale_shift(s, q, gamma, beta):
        s = jnp.sum(s, axis=(0, 1))
        q = jnp.sum(q, axis=(0, 1))
        mean = s / cnt
        var = jnp.maximum(q / cnt - mean * mean, 0.0)
        scale = gamma * jax.lax.rsqrt(var + EPS)
        shift = beta - mean * scale
        return scale.reshape(1, -1), shift.reshape(1, -1)

    sc1, sh1 = bn_scale_shift(s1, q1, g1, b1)

    # ---- pass 2: BN1 + LeakyReLU + conv2 -> pre-BN y2 + per-batch partials --
    flops2 = n * l2 * (4 * c_mid + 2 * K2 * c_mid * c_out_p)
    bytes2 = 4 * (n * l2 * c_mid + 2 * c_mid + w2t.size
                  + n * l2 * c_out_p + 2 * n * c_out_p)
    y2_pre, s2, q2 = pl.pallas_call(
        conv2_kernel,
        out_shape=(jax.ShapeDtypeStruct((n, l2, c_out_p), jnp.float32),
                   jax.ShapeDtypeStruct((n, 1, c_out_p), jnp.float32),
                   jax.ShapeDtypeStruct((n, 1, c_out_p), jnp.float32)),
        grid=(n,),
        in_specs=[batch_spec((l2, c_mid)), full_spec(sc1), full_spec(sh1),
                  full_spec(w2t)],
        out_specs=(batch_spec((l2, c_out_p)), batch_spec((1, c_out_p)),
                   batch_spec((1, c_out_p))),
        scratch_shapes=[pltpu.VMEM((lpad, c_mid), jnp.float32)],
        compiler_params=cparams(),
        cost_estimate=pl.CostEstimate(flops=flops2, transcendentals=0,
                                      bytes_accessed=bytes2),
    )(y1_pre, sc1, sh1, w2t)

    # Padded output channels have y2 == 0 everywhere -> stay exactly 0 after
    # BN (beta = 0), and are sliced off below.
    g2p = jnp.pad(g2, (0, c_out_p - c_out), constant_values=1.0)
    b2p = jnp.pad(b2, (0, c_out_p - c_out))
    sc2, sh2 = bn_scale_shift(s2, q2, g2p, b2p)

    # ---- pass 3: BN2 apply + LeakyReLU -> lane-dense final output ----------
    flops3 = 4 * n * l2 * c_out_p
    bytes3 = 4 * (2 * n * l2 * c_out_p + 2 * c_out_p)
    out_nlc = pl.pallas_call(
        bn_act_kernel,
        out_shape=jax.ShapeDtypeStruct((n, l2, c_out_p), jnp.float32),
        grid=(n,),
        in_specs=[batch_spec((l2, c_out_p)), full_spec(sc2), full_spec(sh2)],
        out_specs=batch_spec((l2, c_out_p)),
        compiler_params=cparams(),
        cost_estimate=pl.CostEstimate(flops=flops3, transcendentals=0,
                                      bytes_accessed=bytes3),
    )(y2_pre, sc2, sh2)

    out = out_nlc[:, :, :c_out]
    return jnp.transpose(out, (0, 2, 1))


def up_forward_ref(x1, x2, params):
    """Pure-JAX reference of the PyTorch forward (training-mode BatchNorm)."""
    w1, g1, b1, w2, g2, b2 = params
    _, _, l1 = x1.shape
    _, _, l2 = x2.shape
    U = jnp.asarray(make_upsample_matrix(l1, l2))             # (L1, L2)
    x1_up = jnp.einsum('ncl,lm->ncm', x1, U)
    x = jnp.concatenate([x2, x1_up], axis=1)

    def conv_bn_lrelu(x, w, g, b, p):
        y = jax.lax.conv_general_dilated(
            x, w, window_strides=(1,), padding=[(p, p)],
            dimension_numbers=('NCH', 'OIH', 'NCH'))
        mean = jnp.mean(y, axis=(0, 2), keepdims=True)
        var = jnp.mean((y - mean) ** 2, axis=(0, 2), keepdims=True)
        z = ((y - mean) * jax.lax.rsqrt(var + EPS) * g.reshape(1, -1, 1)
             + b.reshape(1, -1, 1))
        return jnp.where(z > 0, z, NEG_SLOPE * z)

    y1 = conv_bn_lrelu(x, w1, g1, b1, P1)
    return conv_bn_lrelu(y1, w2, g2, b2, P2)


def init_params(key, in_channels, out_channels):
    """Deterministic init mimicking PyTorch defaults (kaiming-uniform convs,
    BatchNorm weight=1 / bias=0). Shapes follow DoubleConv(in, out, in//2)."""
    mid = in_channels // 2
    k1, k2 = jax.random.split(key)
    bound1 = 1.0 / np.sqrt(in_channels * K1)
    w1 = jax.random.uniform(k1, (mid, in_channels, K1), jnp.float32, -bound1, bound1)
    bound2 = 1.0 / np.sqrt(mid * K2)
    w2 = jax.random.uniform(k2, (out_channels, mid, K2), jnp.float32, -bound2, bound2)
    g1 = jnp.ones((mid,), jnp.float32)
    b1 = jnp.zeros((mid,), jnp.float32)
    g2 = jnp.ones((out_channels,), jnp.float32)
    b2 = jnp.zeros((out_channels,), jnp.float32)
    return w1, g1, b1, w2, g2, b2


if __name__ == "__main__":
    key = jax.random.PRNGKey(0)
    kx1, kx2, kp = jax.random.split(key, 3)

    in_channels, out_channels = 8, 4        # Up(8, 4, bilinear=True)
    N, L1, L2 = 2, 8, 16                    # x1 upsampled 2x -> matches L2
    c_half = in_channels // 2               # skip-connection channel split

    x1 = jax.random.normal(kx1, (N, c_half, L1), jnp.float32)   # deeper feature
    x2 = jax.random.normal(kx2, (N, c_half, L2), jnp.float32)   # skip connection
    params = init_params(kp, in_channels, out_channels)

    out = up_forward(x1, x2, params)
    jax.block_until_ready(out)
    assert out.shape == (N, out_channels, L2)
    assert bool(jnp.all(jnp.isfinite(out)))

    ref = up_forward_ref(x1, x2, params)
    err = float(jnp.max(jnp.abs(out - ref)))
    assert err < 2e-2, f"kernel/reference mismatch: max abs err = {err}"
    print("KERNEL_OK")
</pallas_src>

<mosaic_0001>
module attributes {stable_mosaic.version = 11 : i64} {
  func.func @conv1_kernel(%arg0: i32, %arg1: memref<1x8x4xf32, #tpu.memory_space<vmem>>, %arg2: memref<1x16x4xf32, #tpu.memory_space<vmem>>, %arg3: memref<16x8xf32, #tpu.memory_space<vmem>>, %arg4: memref<11x4x4xf32, #tpu.memory_space<vmem>>, %arg5: memref<11x4x4xf32, #tpu.memory_space<vmem>>, %arg6: memref<1x16x4xf32, #tpu.memory_space<vmem>>, %arg7: memref<1x1x4xf32, #tpu.memory_space<vmem>>, %arg8: memref<1x1x4xf32, #tpu.memory_space<vmem>>, %arg9: memref<32x4xf32, #tpu.memory_space<vmem>>, %arg10: memref<32x4xf32, #tpu.memory_space<vmem>>) attributes {dimension_semantics = [#tpu.dimension_semantics<parallel>], iteration_bounds = array<i64: 2>, scalar_prefetch = 0 : i64, scratch_operands = 2 : i64, tpu.core_type = #tpu.core_type<tc>, window_params = [{transform_indices = @transform_0, window_bounds = array<i64: 1, 8, 4>}, {transform_indices = @transform_1, window_bounds = array<i64: 1, 16, 4>}, {pipeline_mode = #tpu.pipeline_mode<synchronous>, transform_indices = @transform_2, window_bounds = array<i64: 16, 8>}, {pipeline_mode = #tpu.pipeline_mode<synchronous>, transform_indices = @transform_3, window_bounds = array<i64: 11, 4, 4>}, {pipeline_mode = #tpu.pipeline_mode<synchronous>, transform_indices = @transform_4, window_bounds = array<i64: 11, 4, 4>}, {transform_indices = @transform_5, window_bounds = array<i64: 1, 16, 4>}, {transform_indices = @transform_6, window_bounds = array<i64: 1, 1, 4>}, {transform_indices = @transform_7, window_bounds = array<i64: 1, 1, 4>}]} {
    %c0 = arith.constant 0 : index
    %c0_0 = arith.constant 0 : index
    %0 = vector.load %arg3[%c0, %c0_0] : memref<16x8xf32, #tpu.memory_space<vmem>>, vector<16x8xf32>
    %c0_1 = arith.constant 0 : index
    %c0_2 = arith.constant 0 : index
    %c0_3 = arith.constant 0 : index
    %1 = vector.load %arg1[%c0_1, %c0_2, %c0_3] : memref<1x8x4xf32, #tpu.memory_space<vmem>>, vector<1x8x4xf32>
    %2 = vector.shape_cast %1 : vector<1x8x4xf32> to vector<8x4xf32>
    %cst = arith.constant dense<0.000000e+00> : vector<16x4xf32>
    %3 = tpu.matmul %0, %2, %cst {dimension_numbers = #tpu.dot_dimension_numbers<[1], [0], [0], [1], [0, 0, 1, 1], [], []>} : vector<16x8xf32>, vector<8x4xf32>, vector<16x4xf32> -> vector<16x4xf32>
    %cst_4 = arith.constant 0.000000e+00 : f32
    %4 = vector.broadcast %cst_4 : f32 to vector<8x4xf32>
    %c0_5 = arith.constant 0 : index
    %c0_6 = arith.constant 0 : index
    %5 = vector.load %arg9[%c0_5, %c0_6] : memref<32x4xf32, #tpu.memory_space<vmem>>, vector<8x4xf32>
    tpu.vector_store %arg9[%c0_5, %c0_6], %4 {strides = array<i32>} : memref<32x4xf32, #tpu.memory_space<vmem>>, vector<8x4xf32>,
    %c24 = arith.constant 24 : index
    %c0_7 = arith.constant 0 : index
    %6 = vector.load %arg9[%c24, %c0_7] : memref<32x4xf32, #tpu.memory_space<vmem>>, vector<8x4xf32>
    tpu.vector_store %arg9[%c24, %c0_7], %4 {strides = array<i32>} : memref<32x4xf32, #tpu.memory_space<vmem>>, vector<8x4xf32>,
    %cst_8 = arith.constant 0.000000e+00 : f32
    %7 = vector.broadcast %cst_8 : f32 to vector<8x4xf32>
    %c0_9 = arith.constant 0 : index
    %c0_10 = arith.constant 0 : index
    %8 = vector.load %arg10[%c0_9, %c0_10] : memref<32x4xf32, #tpu.memory_space<vmem>>, vector<8x4xf32>
    tpu.vector_store %arg10[%c0_9, %c0_10], %7 {strides = array<i32>} : memref<32x4xf32, #tpu.memory_space<vmem>>, vector<8x4xf32>,
    %c24_11 = arith.constant 24 : index
    %c0_12 = arith.constant 0 : index
    %9 = vector.load %arg10[%c24_11, %c0_12] : memref<32x4xf32, #tpu.memory_space<vmem>>, vector<8x4xf32>
    tpu.vector_store %arg10[%c24_11, %c0_12], %7 {strides = array<i32>} : memref<32x4xf32, #tpu.memory_space<vmem>>, vector<8x4xf32>,
    %c0_13 = arith.constant 0 : index
    %c0_14 = arith.constant 0 : index
    %c0_15 = arith.constant 0 : index
    %10 = vector.load %arg2[%c0_13, %c0_14, %c0_15] : memref<1x16x4xf32, #tpu.memory_space<vmem>>, vector<1x16x4xf32>
    %11 = vector.shape_cast %10 : vector<1x16x4xf32> to vector<16x4xf32>
    %c8 = arith.constant 8 : index
    %c0_16 = arith.constant 0 : index
    %12 = vector.load %arg9[%c8, %c0_16] : memref<32x4xf32, #tpu.memory_space<vmem>>, vector<16x4xf32>
    tpu.vector_store %arg9[%c8, %c0_16], %11 {strides = array<i32>} : memref<32x4xf32, #tpu.memory_space<vmem>>, vector<16x4xf32>,
    %c8_17 = arith.constant 8 : index
    %c0_18 = arith.constant 0 : index
    %13 = vector.load %arg10[%c8_17, %c0_18] : memref<32x4xf32, #tpu.memory_space<vmem>>, vector<16x4xf32>
    tpu.vector_store %arg10[%c8_17, %c0_18], %3 {strides = array<i32>} : memref<32x4xf32, #tpu.memory_space<vmem>>, vector<16x4xf32>,
    %cst_19 = arith.constant 0.000000e+00 : f32
    %14 = vector.broadcast %cst_19 : f32 to vector<16x4xf32>
    %c3 = arith.constant 3 : index
    %c0_20 = arith.constant 0 : index
    %15 = vector.load %arg9[%c3, %c0_20] : memref<32x4xf32, #tpu.memory_space<vmem>>, vector<16x4xf32>
    %c0_21 = arith.constant 0 : index
    %c0_22 = arith.constant 0 : index
    %c0_23 = arith.constant 0 : index
    %16 = vector.load %arg4[%c0_21, %c0_22, %c0_23] : memref<11x4x4xf32, #tpu.memory_space<vmem>>, vector<1x4x4xf32>
    %17 = vector.shape_cast %16 : vector<1x4x4xf32> to vector<4x4xf32>
    %cst_24 = arith.constant dense<0.000000e+00> : vector<16x4xf32>
    %18 = tpu.matmul %15, %17, %cst_24 {dimension_numbers = #tpu.dot_dimension_numbers<[1], [0], [0], [1], [0, 0, 1, 1], [], []>} : vector<16x4xf32>, vector<4x4xf32>, vector<16x4xf32> -> vector<16x4xf32>
    %19 = arith.addf %14, %18 : vector<16x4xf32>
    %c3_25 = arith.constant 3 : index
    %c0_26 = arith.constant 0 : index
    %20 = vector.load %arg10[%c3_25, %c0_26] : memref<32x4xf32, #tpu.memory_space<vmem>>, vector<16x4xf32>
    %c0_27 = arith.constant 0 : index
    %c0_28 = arith.constant 0 : index
    %c0_29 = arith.constant 0 : index
    %21 = vector.load %arg5[%c0_27, %c0_28, %c0_29] : memref<11x4x4xf32, #tpu.memory_space<vmem>>, vector<1x4x4xf32>
    %22 = vector.shape_cast %21 : vector<1x4x4xf32> to vector<4x4xf32>
    %cst_30 = arith.constant dense<0.000000e+00> : vector<16x4xf32>
    %23 = tpu.matmul %20, %22, %cst_30 {dimension_numbers = #tpu.dot_dimension_numbers<[1], [0], [0], [1], [0, 0, 1, 1], [], []>} : vector<16x4xf32>, vector<4x4xf32>, vector<16x4xf32> -> vector<16x4xf32>
    %24 = arith.addf %19, %23 : vector<16x4xf32>
    %c4 = arith.constant 4 : index
    %c0_31 = arith.constant 0 : index
    %25 = vector.load %arg9[%c4, %c0_31] : memref<32x4xf32, #tpu.memory_space<vmem>>, vector<16x4xf32>
    %c1 = arith.constant 1 : index
    %c0_32 = arith.constant 0 : index
    %c0_33 = arith.constant 0 : index
    %26 = vector.load %arg4[%c1, %c0_32, %c0_33] : memref<11x4x4xf32, #tpu.memory_space<vmem>>, vector<1x4x4xf32>
    %27 = vector.shape_cast %26 : vector<1x4x4xf32> to vector<4x4xf32>
    %cst_34 = arith.constant dense<0.000000e+00> : vector<16x4xf32>
    %28 = tpu.matmul %25, %27, %cst_34 {dimension_numbers = #tpu.dot_dimension_numbers<[1], [0], [0], [1], [0, 0, 1, 1], [], []>} : vector<16x4xf32>, vector<4x4xf32>, vector<16x4xf32> -> vector<16x4xf32>
    %29 = arith.addf %24, %28 : vector<16x4xf32>
    %c4_35 = arith.constant 4 : index
    %c0_36 = arith.constant 0 : index
    %30 = vector.load %arg10[%c4_35, %c0_36] : memref<32x4xf32, #tpu.memory_space<vmem>>, vector<16x4xf32>
    %c1_37 = arith.constant 1 : index
    %c0_38 = arith.constant 0 : index
    %c0_39 = arith.constant 0 : index
    %31 = vector.load %arg5[%c1_37, %c0_38, %c0_39] : memref<11x4x4xf32, #tpu.memory_space<vmem>>, vector<1x4x4xf32>
    %32 = vector.shape_cast %31 : vector<1x4x4xf32> to vector<4x4xf32>
    %cst_40 = arith.constant dense<0.000000e+00> : vector<16x4xf32>
    %33 = tpu.matmul %30, %32, %cst_40 {dimension_numbers = #tpu.dot_dimension_numbers<[1], [0], [0], [1], [0, 0, 1, 1], [], []>} : vector<16x4xf32>, vector<4x4xf32>, vector<16x4xf32> -> vector<16x4xf32>
    %34 = arith.addf %29, %33 : vector<16x4xf32>
    %c5 = arith.constant 5 : index
    %c0_41 = arith.constant 0 : index
    %35 = vector.load %arg9[%c5, %c0_41] : memref<32x4xf32, #tpu.memory_space<vmem>>, vector<16x4xf32>
    %c2 = arith.constant 2 : index
    %c0_42 = arith.constant 0 : index
    %c0_43 = arith.constant 0 : index
    %36 = vector.load %arg4[%c2, %c0_42, %c0_43] : memref<11x4x4xf32, #tpu.memory_space<vmem>>, vector<1x4x4xf32>
    %37 = vector.shape_cast %36 : vector<1x4x4xf32> to vector<4x4xf32>
    %cst_44 = arith.constant dense<0.000000e+00> : vector<16x4xf32>
    %38 = tpu.matmul %35, %37, %cst_44 {dimension_numbers = #tpu.dot_dimension_numbers<[1], [0], [0], [1], [0, 0, 1, 1], [], []>} : vector<16x4xf32>, vector<4x4xf32>, vector<16x4xf32> -> vector<16x4xf32>
    %39 = arith.addf %34, %38 : vector<16x4xf32>
    %c5_45 = arith.constant 5 : index
    %c0_46 = arith.constant 0 : index
    %40 = vector.load %arg10[%c5_45, %c0_46] : memref<32x4xf32, #tpu.memory_space<vmem>>, vector<16x4xf32>
    %c2_47 = arith.constant 2 : index
    %c0_48 = arith.constant 0 : index
    %c0_49 = arith.constant 0 : index
    %41 = vector.load %arg5[%c2_47, %c0_48, %c0_49] : memref<11x4x4xf32, #tpu.memory_space<vmem>>, vector<1x4x4xf32>
    %42 = vector.shape_cast %41 : vector<1x4x4xf32> to vector<4x4xf32>
    %cst_50 = arith.constant dense<0.000000e+00> : vector<16x4xf32>
    %43 = tpu.matmul %40, %42, %cst_50 {dimension_numbers = #tpu.dot_dimension_numbers<[1], [0], [0], [1], [0, 0, 1, 1], [], []>} : vector<16x4xf32>, vector<4x4xf32>, vector<16x4xf32> -> vector<16x4xf32>
    %44 = arith.addf %39, %43 : vector<16x4xf32>
    %c6 = arith.constant 6 : index
    %c0_51 = arith.constant 0 : index
    %45 = vector.load %arg9[%c6, %c0_51] : memref<32x4xf32, #tpu.memory_space<vmem>>, vector<16x4xf32>
    %c3_52 = arith.constant 3 : index
    %c0_53 = arith.constant 0 : index
    %c0_54 = arith.constant 0 : index
    %46 = vector.load %arg4[%c3_52, %c0_53, %c0_54] : memref<11x4x4xf32, #tpu.memory_space<vmem>>, vector<1x4x4xf32>
    %47 = vector.shape_cast %46 : vector<1x4x4xf32> to vector<4x4xf32>
    %cst_55 = arith.constant dense<0.000000e+00> : vector<16x4xf32>
    %48 = tpu.matmul %45, %47, %cst_55 {dimension_numbers = #tpu.dot_dimension_numbers<[1], [0], [0], [1], [0, 0, 1, 1], [], []>} : vector<16x4xf32>, vector<4x4xf32>, vector<16x4xf32> -> vector<16x4xf32>
    %49 = arith.addf %44, %48 : vector<16x4xf32>
    %c6_56 = arith.constant 6 : index
    %c0_57 = arith.constant 0 : index
    %50 = vector.load %arg10[%c6_56, %c0_57] : memref<32x4xf32, #tpu.memory_space<vmem>>, vector<16x4xf32>
    %c3_58 = arith.constant 3 : index
    %c0_59 = arith.constant 0 : index
    %c0_60 = arith.constant 0 : index
    %51 = vector.load %arg5[%c3_58, %c0_59, %c0_60] : memref<11x4x4xf32, #tpu.memory_space<vmem>>, vector<1x4x4xf32>
    %52 = vector.shape_cast %51 : vector<1x4x4xf32> to vector<4x4xf32>
    %cst_61 = arith.constant dense<0.000000e+00> : vector<16x4xf32>
    %53 = tpu.matmul %50, %52, %cst_61 {dimension_numbers = #tpu.dot_dimension_numbers<[1], [0], [0], [1], [0, 0, 1, 1], [], []>} : vector<16x4xf32>, vector<4x4xf32>, vector<16x4xf32> -> vector<16x4xf32>
    %54 = arith.addf %49, %53 : vector<16x4xf32>
    %c7 = arith.constant 7 : index
    %c0_62 = arith.constant 0 : index
    %55 = vector.load %arg9[%c7, %c0_62] : memref<32x4xf32, #tpu.memory_space<vmem>>, vector<16x4xf32>
    %c4_63 = arith.constant 4 : index
    %c0_64 = arith.constant 0 : index
    %c0_65 = arith.constant 0 : index
    %56 = vector.load %arg4[%c4_63, %c0_64, %c0_65] : memref<11x4x4xf32, #tpu.memory_space<vmem>>, vector<1x4x4xf32>
    %57 = vector.shape_cast %56 : vector<1x4x4xf32> to vector<4x4xf32>
    %cst_66 = arith.constant dense<0.000000e+00> : vector<16x4xf32>
    %58 = tpu.matmul %55, %57, %cst_66 {dimension_numbers = #tpu.dot_dimension_numbers<[1], [0], [0], [1], [0, 0, 1, 1], [], []>} : vector<16x4xf32>, vector<4x4xf32>, vector<16x4xf32> -> vector<16x4xf32>
    %59 = arith.addf %54, %58 : vector<16x4xf32>
    %c7_67 = arith.constant 7 : index
    %c0_68 = arith.constant 0 : index
    %60 = vector.load %arg10[%c7_67, %c0_68] : memref<32x4xf32, #tpu.memory_space<vmem>>, vector<16x4xf32>
    %c4_69 = arith.constant 4 : index
    %c0_70 = arith.constant 0 : index
    %c0_71 = arith.constant 0 : index
    %61 = vector.load %arg5[%c4_69, %c0_70, %c0_71] : memref<11x4x4xf32, #tpu.memory_space<vmem>>, vector<1x4x4xf32>
    %62 = vector.shape_cast %61 : vector<1x4x4xf32> to vector<4x4xf32>
    %cst_72 = arith.constant dense<0.000000e+00> : vector<16x4xf32>
    %63 = tpu.matmul %60, %62, %cst_72 {dimension_numbers = #tpu.dot_dimension_numbers<[1], [0], [0], [1], [0, 0, 1, 1], [], []>} : vector<16x4xf32>, vector<4x4xf32>, vector<16x4xf32> -> vector<16x4xf32>
    %64 = arith.addf %59, %63 : vector<16x4xf32>
    %c8_73 = arith.constant 8 : index
    %c0_74 = arith.constant 0 : index
    %65 = vector.load %arg9[%c8_73, %c0_74] : memref<32x4xf32, #tpu.memory_space<vmem>>, vector<16x4xf32>
    %c5_75 = arith.constant 5 : index
    %c0_76 = arith.constant 0 : index
    %c0_77 = arith.constant 0 : index
    %66 = vector.load %arg4[%c5_75, %c0_76, %c0_77] : memref<11x4x4xf32, #tpu.memory_space<vmem>>, vector<1x4x4xf32>
    %67 = vector.shape_cast %66 : vector<1x4x4xf32> to vector<4x4xf32>
    %cst_78 = arith.constant dense<0.000000e+00> : vector<16x4xf32>
    %68 = tpu.matmul %65, %67, %cst_78 {dimension_numbers = #tpu.dot_dimension_numbers<[1], [0], [0], [1], [0, 0, 1, 1], [], []>} : vector<16x4xf32>, vector<4x4xf32>, vector<16x4xf32> -> vector<16x4xf32>
    %69 = arith.addf %64, %68 : vector<16x4xf32>
    %c8_79 = arith.constant 8 : index
    %c0_80 = arith.constant 0 : index
    %70 = vector.load %arg10[%c8_79, %c0_80] : memref<32x4xf32, #tpu.memory_space<vmem>>, vector<16x4xf32>
    %c5_81 = arith.constant 5 : index
    %c0_82 = arith.constant 0 : index
    %c0_83 = arith.constant 0 : index
    %71 = vector.load %arg5[%c5_81, %c0_82, %c0_83] : memref<11x4x4xf32, #tpu.memory_space<vmem>>, vector<1x4x4xf32>
    %72 = vector.shape_cast %71 : vector<1x4x4xf32> to vector<4x4xf32>
    %cst_84 = arith.constant dense<0.000000e+00> : vector<16x4xf32>
    %73 = tpu.matmul %70, %72, %cst_84 {dimension_numbers = #tpu.dot_dimension_numbers<[1], [0], [0], [1], [0, 0, 1, 1], [], []>} : vector<16x4xf32>, vector<4x4xf32>, vector<16x4xf32> -> vector<16x4xf32>
    %74 = arith.addf %69, %73 : vector<16x4xf32>
    %c9 = arith.constant 9 : index
    %c0_85 = arith.constant 0 : index
    %75 = vector.load %arg9[%c9, %c0_85] : memref<32x4xf32, #tpu.memory_space<vmem>>, vector<16x4xf32>
    %c6_86 = arith.constant 6 : index
    %c0_87 = arith.constant 0 : index
    %c0_88 = arith.constant 0 : index
    %76 = vector.load %arg4[%c6_86, %c0_87, %c0_88] : memref<11x4x4xf32, #tpu.memory_space<vmem>>, vector<1x4x4xf32>
    %77 = vector.shape_cast %76 : vector<1x4x4xf32> to vector<4x4xf32>
    %cst_89 = arith.constant dense<0.000000e+00> : vector<16x4xf32>
    %78 = tpu.matmul %75, %77, %cst_89 {dimension_numbers = #tpu.dot_dimension_numbers<[1], [0], [0], [1], [0, 0, 1, 1], [], []>} : vector<16x4xf32>, vector<4x4xf32>, vector<16x4xf32> -> vector<16x4xf32>
    %79 = arith.addf %74, %78 : vector<16x4xf32>
    %c9_90 = arith.constant 9 : index
    %c0_91 = arith.constant 0 : index
    %80 = vector.load %arg10[%c9_90, %c0_91] : memref<32x4xf32, #tpu.memory_space<vmem>>, vector<16x4xf32>
    %c6_92 = arith.constant 6 : index
    %c0_93 = arith.constant 0 : index
    %c0_94 = arith.constant 0 : index
    %81 = vector.load %arg5[%c6_92, %c0_93, %c0_94] : memref<11x4x4xf32, #tpu.memory_space<vmem>>, vector<1x4x4xf32>
    %82 = vector.shape_cast %81 : vector<1x4x4xf32> to vector<4x4xf32>
    %cst_95 = arith.constant dense<0.000000e+00> : vector<16x4xf32>
    %83 = tpu.matmul %80, %82, %cst_95 {dimension_numbers = #tpu.dot_dimension_numbers<[1], [0], [0], [1], [0, 0, 1, 1], [], []>} : vector<16x4xf32>, vector<4x4xf32>, vector<16x4xf32> -> vector<16x4xf32>
    %84 = arith.addf %79, %83 : vector<16x4xf32>
    %c10 = arith.constant 10 : index
    %c0_96 = arith.constant 0 : index
    %85 = vector.load %arg9[%c10, %c0_96] : memref<32x4xf32, #tpu.memory_space<vmem>>, vector<16x4xf32>
    %c7_97 = arith.constant 7 : index
    %c0_98 = arith.constant 0 : index
    %c0_99 = arith.constant 0 : index
    %86 = vector.load %arg4[%c7_97, %c0_98, %c0_99] : memref<11x4x4xf32, #tpu.memory_space<vmem>>, vector<1x4x4xf32>
    %87 = vector.shape_cast %86 : vector<1x4x4xf32> to vector<4x4xf32>
    %cst_100 = arith.constant dense<0.000000e+00> : vector<16x4xf32>
    %88 = tpu.matmul %85, %87, %cst_100 {dimension_numbers = #tpu.dot_dimension_numbers<[1], [0], [0], [1], [0, 0, 1, 1], [], []>} : vector<16x4xf32>, vector<4x4xf32>, vector<16x4xf32> -> vector<16x4xf32>
    %89 = arith.addf %84, %88 : vector<16x4xf32>
    %c10_101 = arith.constant 10 : index
    %c0_102 = arith.constant 0 : index
    %90 = vector.load %arg10[%c10_101, %c0_102] : memref<32x4xf32, #tpu.memory_space<vmem>>, vector<16x4xf32>
    %c7_103 = arith.constant 7 : index
    %c0_104 = arith.constant 0 : index
    %c0_105 = arith.constant 0 : index
    %91 = vector.load %arg5[%c7_103, %c0_104, %c0_105] : memref<11x4x4xf32, #tpu.memory_space<vmem>>, vector<1x4x4xf32>
    %92 = vector.shape_cast %91 : vector<1x4x4xf32> to vector<4x4xf32>
    %cst_106 = arith.constant dense<0.000000e+00> : vector<16x4xf32>
    %93 = tpu.matmul %90, %92, %cst_106 {dimension_numbers = #tpu.dot_dimension_numbers<[1], [0], [0], [1], [0, 0, 1, 1], [], []>} : vector<16x4xf32>, vector<4x4xf32>, vector<16x4xf32> -> vector<16x4xf32>
    %94 = arith.addf %89, %93 : vector<16x4xf32>
    %c11 = arith.constant 11 : index
    %c0_107 = arith.constant 0 : index
    %95 = vector.load %arg9[%c11, %c0_107] : memref<32x4xf32, #tpu.memory_space<vmem>>, vector<16x4xf32>
    %c8_108 = arith.constant 8 : index
    %c0_109 = arith.constant 0 : index
    %c0_110 = arith.constant 0 : index
    %96 = vector.load %arg4[%c8_108, %c0_109, %c0_110] : memref<11x4x4xf32, #tpu.memory_space<vmem>>, vector<1x4x4xf32>
    %97 = vector.shape_cast %96 : vector<1x4x4xf32> to vector<4x4xf32>
    %cst_111 = arith.constant dense<0.000000e+00> : vector<16x4xf32>
    %98 = tpu.matmul %95, %97, %cst_111 {dimension_numbers = #tpu.dot_dimension_numbers<[1], [0], [0], [1], [0, 0, 1, 1], [], []>} : vector<16x4xf32>, vector<4x4xf32>, vector<16x4xf32> -> vector<16x4xf32>
    %99 = arith.addf %94, %98 : vector<16x4xf32>
    %c11_112 = arith.constant 11 : index
    %c0_113 = arith.constant 0 : index
    %100 = vector.load %arg10[%c11_112, %c0_113] : memref<32x4xf32, #tpu.memory_space<vmem>>, vector<16x4xf32>
    %c8_114 = arith.constant 8 : index
    %c0_115 = arith.constant 0 : index
    %c0_116 = arith.constant 0 : index
    %101 = vector.load %arg5[%c8_114, %c0_115, %c0_116] : memref<11x4x4xf32, #tpu.memory_space<vmem>>, vector<1x4x4xf32>
    %102 = vector.shape_cast %101 : vector<1x4x4xf32> to vector<4x4xf32>
    %cst_117 = arith.constant dense<0.000000e+00> : vector<16x4xf32>
    %103 = tpu.matmul %100, %102, %cst_117 {dimension_numbers = #tpu.dot_dimension_numbers<[1], [0], [0], [1], [0, 0, 1, 1], [], []>} : vector<16x4xf32>, vector<4x4xf32>, vector<16x4xf32> -> vector<16x4xf32>
    %104 = arith.addf %99, %103 : vector<16x4xf32>
    %c12 = arith.constant 12 : index
    %c0_118 = arith.constant 0 : index
    %105 = vector.load %arg9[%c12, %c0_118] : memref<32x4xf32, #tpu.memory_space<vmem>>, vector<16x4xf32>
    %c9_119 = arith.constant 9 : index
    %c0_120 = arith.constant 0 : index
    %c0_121 = arith.constant 0 : index
    %106 = vector.load %arg4[%c9_119, %c0_120, %c0_121] : memref<11x4x4xf32, #tpu.memory_space<vmem>>, vector<1x4x4xf32>
    %107 = vector.shape_cast %106 : vector<1x4x4xf32> to vector<4x4xf32>
    %cst_122 = arith.constant dense<0.000000e+00> : vector<16x4xf32>
    %108 = tpu.matmul %105, %107, %cst_122 {dimension_numbers = #tpu.dot_dimension_numbers<[1], [0], [0], [1], [0, 0, 1, 1], [], []>} : vector<16x4xf32>, vector<4x4xf32>, vector<16x4xf32> -> vector<16x4xf32>
    %109 = arith.addf %104, %108 : vector<16x4xf32>
    %c12_123 = arith.constant 12 : index
    %c0_124 = arith.constant 0 : index
    %110 = vector.load %arg10[%c12_123, %c0_124] : memref<32x4xf32, #tpu.memory_space<vmem>>, vector<16x4xf32>
    %c9_125 = arith.constant 9 : index
    %c0_126 = arith.constant 0 : index
    %c0_127 = arith.constant 0 : index
    %111 = vector.load %arg5[%c9_125, %c0_126, %c0_127] : memref<11x4x4xf32, #tpu.memory_space<vmem>>, vector<1x4x4xf32>
    %112 = vector.shape_cast %111 : vector<1x4x4xf32> to vector<4x4xf32>
    %cst_128 = arith.constant dense<0.000000e+00> : vector<16x4xf32>
    %113 = tpu.matmul %110, %112, %cst_128 {dimension_numbers = #tpu.dot_dimension_numbers<[1], [0], [0], [1], [0, 0, 1, 1], [], []>} : vector<16x4xf32>, vector<4x4xf32>, vector<16x4xf32> -> vector<16x4xf32>
    %114 = arith.addf %109, %113 : vector<16x4xf32>
    %c13 = arith.constant 13 : index
    %c0_129 = arith.constant 0 : index
    %115 = vector.load %arg9[%c13, %c0_129] : memref<32x4xf32, #tpu.memory_space<vmem>>, vector<16x4xf32>
    %c10_130 = arith.constant 10 : index
    %c0_131 = arith.constant 0 : index
    %c0_132 = arith.constant 0 : index
    %116 = vector.load %arg4[%c10_130, %c0_131, %c0_132] : memref<11x4x4xf32, #tpu.memory_space<vmem>>, vector<1x4x4xf32>
    %117 = vector.shape_cast %116 : vector<1x4x4xf32> to vector<4x4xf32>
    %cst_133 = arith.constant dense<0.000000e+00> : vector<16x4xf32>
    %118 = tpu.matmul %115, %117, %cst_133 {dimension_numbers = #tpu.dot_dimension_numbers<[1], [0], [0], [1], [0, 0, 1, 1], [], []>} : vector<16x4xf32>, vector<4x4xf32>, vector<16x4xf32> -> vector<16x4xf32>
    %119 = arith.addf %114, %118 : vector<16x4xf32>
    %c13_134 = arith.constant 13 : index
    %c0_135 = arith.constant 0 : index
    %120 = vector.load %arg10[%c13_134, %c0_135] : memref<32x4xf32, #tpu.memory_space<vmem>>, vector<16x4xf32>
    %c10_136 = arith.constant 10 : index
    %c0_137 = arith.constant 0 : index
    %c0_138 = arith.constant 0 : index
    %121 = vector.load %arg5[%c10_136, %c0_137, %c0_138] : memref<11x4x4xf32, #tpu.memory_space<vmem>>, vector<1x4x4xf32>
    %122 = vector.shape_cast %121 : vector<1x4x4xf32> to vector<4x4xf32>
    %cst_139 = arith.constant dense<0.000000e+00> : vector<16x4xf32>
    %123 = tpu.matmul %120, %122, %cst_139 {dimension_numbers = #tpu.dot_dimension_numbers<[1], [0], [0], [1], [0, 0, 1, 1], [], []>} : vector<16x4xf32>, vector<4x4xf32>, vector<16x4xf32> -> vector<16x4xf32>
    %124 = arith.addf %119, %123 : vector<16x4xf32>
    %125 = vector.shape_cast %124 : vector<16x4xf32> to vector<1x16x4xf32>
    %c0_140 = arith.constant 0 : index
    %c0_141 = arith.constant 0 : index
    %c0_142 = arith.constant 0 : index
    %126 = vector.load %arg6[%c0_140, %c0_141, %c0_142] : memref<1x16x4xf32, #tpu.memory_space<vmem>>, vector<1x16x4xf32>
    tpu.vector_store %arg6[%c0_140, %c0_141, %c0_142], %125 {strides = array<i32>} : memref<1x16x4xf32, #tpu.memory_space<vmem>>, vector<1x16x4xf32>,
    %cst_143 = arith.constant dense<0.000000e+00> : vector<4xf32>
    %127 = vector.multi_reduction <add>, %124, %cst_143 [0] : vector<16x4xf32> to vector<4xf32>
    %128 = vector.shape_cast %127 : vector<4xf32> to vector<1x4xf32>
    %129 = vector.shape_cast %128 : vector<1x4xf32> to vector<1x1x4xf32>
    %c0_144 = arith.constant 0 : index
    %c0_145 = arith.constant 0 : index
    %c0_146 = arith.constant 0 : index
    %130 = vector.load %arg7[%c0_144, %c0_145, %c0_146] : memref<1x1x4xf32, #tpu.memory_space<vmem>>, vector<1x1x4xf32>
    tpu.vector_store %arg7[%c0_144, %c0_145, %c0_146], %129 {strides = array<i32>} : memref<1x1x4xf32, #tpu.memory_space<vmem>>, vector<1x1x4xf32>,
    %131 = arith.mulf %124, %124 : vector<16x4xf32>
    %cst_147 = arith.constant dense<0.000000e+00> : vector<4xf32>
    %132 = vector.multi_reduction <add>, %131, %cst_147 [0] : vector<16x4xf32> to vector<4xf32>
    %133 = vector.shape_cast %132 : vector<4xf32> to vector<1x4xf32>
    %134 = vector.shape_cast %133 : vector<1x4xf32> to vector<1x1x4xf32>
    %c0_148 = arith.constant 0 : index
    %c0_149 = arith.constant 0 : index
    %c0_150 = arith.constant 0 : index
    %135 = vector.load %arg8[%c0_148, %c0_149, %c0_150] : memref<1x1x4xf32, #tpu.memory_space<vmem>>, vector<1x1x4xf32>
    tpu.vector_store %arg8[%c0_148, %c0_149, %c0_150], %134 {strides = array<i32>} : memref<1x1x4xf32, #tpu.memory_space<vmem>>, vector<1x1x4xf32>,
    return
  }
  func.func @transform_0(%arg0: i32) -> (i32, i32, i32) {
    %c0_i32 = arith.constant 0 : i32
    %c0_i32_0 = arith.constant 0 : i32
    %c0_i32_1 = arith.constant 0 : i32
    return %arg0, %c0_i32, %c0_i32_0 : i32, i32, i32
  }
  func.func @transform_1(%arg0: i32) -> (i32, i32, i32) {
    %c0_i32 = arith.constant 0 : i32
    %c0_i32_0 = arith.constant 0 : i32
    %c0_i32_1 = arith.constant 0 : i32
    return %arg0, %c0_i32, %c0_i32_0 : i32, i32, i32
  }
  func.func @transform_2(%arg0: i32) -> (i32, i32) {
    %c0_i32 = arith.constant 0 : i32
    %c0_i32_0 = arith.constant 0 : i32
    %c0_i32_1 = arith.constant 0 : i32
    return %c0_i32, %c0_i32_0 : i32, i32
  }
  func.func @transform_3(%arg0: i32) -> (i32, i32, i32) {
    %c0_i32 = arith.constant 0 : i32
    %c0_i32_0 = arith.constant 0 : i32
    %c0_i32_1 = arith.constant 0 : i32
    %c0_i32_2 = arith.constant 0 : i32
    return %c0_i32, %c0_i32_0, %c0_i32_1 : i32, i32, i32
  }
  func.func @transform_4(%arg0: i32) -> (i32, i32, i32) {
    %c0_i32 = arith.constant 0 : i32
    %c0_i32_0 = arith.constant 0 : i32
    %c0_i32_1 = arith.constant 0 : i32
    %c0_i32_2 = arith.constant 0 : i32
    return %c0_i32, %c0_i32_0, %c0_i32_1 : i32, i32, i32
  }
  func.func @transform_5(%arg0: i32) -> (i32, i32, i32) {
    %c0_i32 = arith.constant 0 : i32
    %c0_i32_0 = arith.constant 0 : i32
    %c0_i32_1 = arith.constant 0 : i32
    return %arg0, %c0_i32, %c0_i32_0 : i32, i32, i32
  }
  func.func @transform_6(%arg0: i32) -> (i32, i32, i32) {
    %c0_i32 = arith.constant 0 : i32
    %c0_i32_0 = arith.constant 0 : i32
    %c0_i32_1 = arith.constant 0 : i32
    return %arg0, %c0_i32, %c0_i32_0 : i32, i32, i32
  }
  func.func @transform_7(%arg0: i32) -> (i32, i32, i32) {
    %c0_i32 = arith.constant 0 : i32
    %c0_i32_0 = arith.constant 0 : i32
    %c0_i32_1 = arith.constant 0 : i32
    return %arg0, %c0_i32, %c0_i32_0 : i32, i32, i32
  }
}

</mosaic_0001>

<bundles_post_ra>
// kernel: tpu_custom_call.1
= control target key start
LH: loop header
LB: loop body
LE: loop exit
PB: predicated region body
PF: predicated region fallthrough
CT: control target
= control target key end

     0   :  { %13 = vsyncpa [#allocation5], 0  ;;  %s3420_s0 = inlined_call_operand.vmem [shape: f32[2,8,4], index: 0, kind: input, shape index: {}]   ;;  %s3421_s1 = inlined_call_operand.vmem [shape: f32[2,16,4], index: 1, kind: input, shape index: {}]   ;;  %s3422_s2 = inlined_call_operand.vmem [shape: f32[16,8], index: 2, kind: input, shape index: {}]   ;;  %s3423_s3 = inlined_call_operand.vmem [shape: f32[11,4,4], index: 3, kind: input, shape index: {}]   ;;  %s3424_s4 = inlined_call_operand.vmem [shape: f32[11,4,4], index: 4, kind: input, shape index: {}]   ;;  %s3425_s5 = inlined_call_operand.vmem [shape: f32[2,16,4], index: 5, kind: output, shape index: {0}]   ;;  %s3426_s6 = inlined_call_operand.hbm [shape: f32[2,1,4], index: 6, kind: output, shape index: {1}]   ;;  %s3427_s7 = inlined_call_operand.hbm [shape: f32[2,1,4], index: 7, kind: output, shape index: {2}]  }
   0x1   :  { %15 = vsyncpa [#allocation5 + $0x1], 0 }
   0x2   :  { %16 = vsyncpa [#allocation7], 0 }
   0x3   :  { %18 = vsyncpa [#allocation7 + $0x1], 0  ;;  %s3082_s24 = smov 0   ;;  %s3084_s25 = smov 0  }
   0x4   :  { %s3086_s26 = smov 0   ;;  %s3088_s27 = smov 0  }
   0x5 LB: > { %s3103_s28 = sadd.s32 4294967295, %s3037_s27   ;;  %s2569_s29 = sadd.s32 4294967294, %s3037_s27   ;;  %s3037_s27 = sphi %s3088_s27, %s3433_s27   ;;  %s3033_s26 = sphi %s3086_s26, %s3432_s26   ;;  %s3029_s25 = sphi %s3084_s25, %s3431_s25   ;;  %s3025_s24 = sphi %s3082_s24, %s3430_s24  }
   0x6   : > { %s3107_s30 = sadd.s32 1, %s3037_s27   ;;  %s172_s8 = sadd.s32 1, %s3033_s26 }
   0x7   : > { %s169_s9 = ssub.s32 %s3037_s27, %s3107_s30  ;;  %p182_p0 = scmp.ne.s32.totalorder %s3033_s26, %s3029_s25 }
   0x8   : > { %p170_p1 = scmp.eq.s32.totalorder %s169_s9, 0  ;;  %p183_p2 = scmp.eq.s32.totalorder %s3103_s28, 1 }
   0x9   : > { %p188_p3 = scmp.ne.s32.totalorder %s3029_s25, %s3025_s24  ;;  %p189_p4 = scmp.eq.s32.totalorder %s2569_s29, 1 }
   0xa   : > { %s3118_s10 = scalar_select %p170_p1, %s3033_s26, %s172_s8  }
   0xb   : > { %p3120_p5 = por %p183_p2, %p182_p0  ;;  %p3124_p6 = por %p189_p4, %p188_p3 }
   0xc   : > { %p2572_p7 = scmp.ge.s32.totalorder %s3037_s27, 1  ;;  %p257_p8 = scmp.lt.s32.totalorder %s3037_s27, 3 }
   0xe   : > { %p258_p9 = pnand %p2572_p7, %p257_p8 }
   0xf   : > { %p301_p10 = scmp.lt.s32.totalorder (!%p258_p9), %s3103_s28, 1  ;;  %v315_v0 = vld [vmem:[%s3422_s2] sm:$0xff] (!%p258_p9)  ;;  %vm318_vm0 = vcmask (!%p258_p9), 64512   ;;  %vm400_vm1 = vcmask (!%p258_p9), 31744   ;;  %v316_v1 = vld [vmem:[%s3422_s2 + $0x8] sm:$0xff] (!%p258_p9)  ;;  %vm423_vm2 = vcmask (!%p258_p9), 1043456  }
  0x10   : > { %261 = sbr.rel (%p258_p9) target bundleno = 600 (0x258), region = 40  ;;  %2743 = vmatprep.mubr.msk.f32.mxu0 (!%p258_p9), %vm318_vm0, %v315_v0  ;;  %v2618_v5 = vld [vmem:[%s3423_s3 + $0x14] sm:$0xf] (!%p258_p9)  ;;  %v3039_v7 = vmov (!%p258_p9), 0.0   ;;  %v416_v10 = vld [vmem:[%s3424_s4] sm:$0xf] (!%p258_p9) }
  0x11   : > { %2796 = vmatprep.subr.msk.mxu1 (!%p258_p9), %vm423_vm2, %v2618_v5  ;;  %403 = vst.msk [vmem:[#allocation3] sm:$0xff] (!%p258_p9), %vm400_vm1, %v3039_v7  ;;  %401 = vst.msk [vmem:[#allocation2] sm:$0xff] (!%p258_p9), %vm400_vm1, %v3039_v7  ;;  %v2622_v8 = vld [vmem:[%s3424_s4 + $0x14] sm:$0xf] (!%p258_p9)  ;;  %v2626_v11 = vld [vmem:[%s3423_s3 + $0x18] sm:$0xf] (!%p258_p9) }
  0x12   : > { %402 = vst.msk [vmem:[#allocation2 + $0x18] sm:$0xff] (!%p258_p9), %vm400_vm1, %v3039_v7  ;;  %404 = vst.msk [vmem:[#allocation3 + $0x18] sm:$0xff] (!%p258_p9), %vm400_vm1, %v3039_v7  ;;  %2797 = vmatpush3.msk.msra.mxu1 (!%p258_p9), %vm423_vm2, %v2618_v5  ;;  %v413_v12 = vld [vmem:[%s3423_s3] sm:$0xf] (!%p258_p9)  ;;  %v2630_v21 = vld [vmem:[%s3424_s4 + $0x18] sm:$0xf] (!%p258_p9) }
  0x13   : > { %2801 = vmatprep.subr.msk.mxu1 (!%p258_p9), %vm423_vm2, %v2622_v8  ;;  %v2586_v22 = vld [vmem:[%s3423_s3 + $0x4] sm:$0xf] (!%p258_p9)  ;;  %v2634_v27 = vld [vmem:[%s3423_s3 + $0x1c] sm:$0xf] (!%p258_p9)  ;;  %v2594_v34 = vld [vmem:[%s3423_s3 + $0x8] sm:$0xf] (!%p258_p9) }
  0x14   : > { %v2590_v28 = vld [vmem:[%s3424_s4 + $0x4] sm:$0xf] (!%p258_p9)  ;;  %v2638_v33 = vld [vmem:[%s3424_s4 + $0x1c] sm:$0xf] (!%p258_p9)  ;;  %v2642_v39 = vld [vmem:[%s3423_s3 + $0x20] sm:$0xf] (!%p258_p9) }
  0x15   : > { %v2598_v40 = vld [vmem:[%s3424_s4 + $0x8] sm:$0xf] (!%p258_p9)  ;;  %v2646_v44 = vld [vmem:[%s3424_s4 + $0x20] sm:$0xf] (!%p258_p9)  ;;  %v2602_v45 = vld [vmem:[%s3423_s3 + $0xc] sm:$0xf] (!%p258_p9) }
  0x16   : > { %v2650_v49 = vld [vmem:[%s3423_s3 + $0x24] sm:$0xf] (!%p258_p9)  ;;  %v2606_v50 = vld [vmem:[%s3424_s4 + $0xc] sm:$0xf] (!%p258_p9)  ;;  %v2610_v55 = vld [vmem:[%s3423_s3 + $0x10] sm:$0xf] (!%p258_p9) }
  0x17   : > { %s3136_s15 = scalar_select %p301_p10, %s3103_s28, 1  ;;  %v2654_v54 = vld [vmem:[%s3424_s4 + $0x24] sm:$0xf]  ;;  %v2658_v59 = vld [vmem:[%s3423_s3 + $0x28] sm:$0xf]  ;;  %vm2397_vm3 = vcmask 24576  }
  0x18   : > { %v2614_v60 = vld [vmem:[%s3424_s4 + $0x10] sm:$0xf]  ;;  %v2662_v0 = vld [vmem:[%s3424_s4 + $0x28] sm:$0xf] }
  0x19   : > { %s2573_s16 = sshll.u32 %s3136_s15, 3  ;;  %s2670_s17 = sshll.u32 %s3136_s15, 4 }
  0x1a   : > { %s304_s20 = scalar_lea.vmem %s3420_s0, %s2573_s16  ;;  %s309_s23 = scalar_lea.vmem %s3421_s1, %s2670_s17 }
  0x1b   : > { %v317_v2 = vld [vmem:[%s304_s20] sm:$0xff]  ;;  %v406_v4 = vld [vmem:[%s309_s23 + $0x8] sm:$0xff]  ;;  %s314_s29 = scalar_lea.vmem %s3425_s5, %s2670_s17  ;;  %s3334_s15 = sand.u32 1, %s3029_s25  }
  0x1c   : > { %v405_v3 = vld [vmem:[%s309_s23] sm:$0xff]  ;;  %2741 = vmatprep.subr.mxu0 %v317_v2  ;;  %408 = vst.msk [vmem:[#allocation2 + $0x10] sm:$0xff] %vm400_vm1, %v406_v4  ;;  %s2666_s17 = sshll.u32 %s3103_s28, 4  ;;  %s294_s8 = scalar_lea.vmem [#allocation4], %s3334_s15 }
  0x1d   : > { %407 = vst.msk [vmem:[#allocation2 + $0x8] sm:$0xff] %vm400_vm1, %v405_v3  ;;  %2742 = vmatpush3.msra.mxu0 %v317_v2  ;;  %s2436_s9 = sshll.u32 %s294_s8, 4  ;;  %s300_s13 = scalar_lea.vmem [#allocation6], %s3334_s15  ;;  %s3346_s9 = int_to_ptr.vmem [resolvable:$true] %s2436_s9 }
  0x1e   : > { %2744 = vmatmul.mubr.msk.f32.vlgmr.msra.gmra.mrb[0].mxu0 %vm318_vm0, %v316_v1  ;;  %2746 = vmatprep.subr.msk.mxu0 %vm423_vm2, %v416_v10  ;;  %s2449_s14 = sshll.u32 %s300_s13, 4  ;;  %s3344_s19 = scalar_lea.hbm %s3426_s6, %s2666_s17  ;;  %s3354_s14 = int_to_ptr.vmem [resolvable:$true] %s2449_s14 }
  0x1f   : > { %2747 = vmatpush3.msk.msra.mxu0 %vm423_vm2, %v416_v10  ;;  %s3352_s21 = scalar_lea.hbm %s3427_s7, %s2666_s17  ;;  %s2417_s22 = scalar_lea.sflag [#allocation5], %s3334_s15 }
  0x20   : > { %2751 = vmatprep.subr.msk.mxu0 %vm423_vm2, %v413_v12  ;;  %s2943_s23 = scalar_lea.vmem %s3346_s9, 16 }
  0x21   : > { %p2944_p11 = scmp.ne.s32.totalorder %s3346_s9, %s2943_s23 }
  0x23   : > { %v1307_v9 = vld [vmem:[#allocation2 + $0x10] sm:$0xff]  ;;  %p2945_p12 = pnand %p2944_p11, %p3120_p5 }
  0x24   : > { %v1306_v6 = vld [vmem:[#allocation2 + $0x8] sm:$0xff]  ;;  %v1487_v24 = vld [vmem:[#allocation2 + $0x11] sm:$0xff] }
  0x25   : > { %2798 = vmatprep.mubr.msk.f32.mxu1 %vm400_vm1, %v1306_v6  ;;  %v411_v19 = vld [vmem:[#allocation2 + $0x3] sm:$0xff]  ;;  %v412_v23 = vld [vmem:[#allocation2 + $0xb] sm:$0xff]  ;;  %v1847_v46 = vld [vmem:[#allocation2 + $0x13] sm:$0xff]  ;;  %p2946_p13 = pneg %p2945_p12 }
  0x26   : > { %2799 = vmatmul.mubr.msk.f32.vlgmr.msra.gmra.mrb[0].mxu1 %vm400_vm1, %v1307_v9  ;;  %v1486_v20 = vld [vmem:[#allocation2 + $0x9] sm:$0xff]  ;;  %v1667_v35 = vld [vmem:[#allocation2 + $0x12] sm:$0xff] }
  0x27   : > { %2802 = vmatpush3.msk.msra.mxu1 %vm423_vm2, %v2622_v8  ;;  %v586_v25 = vld [vmem:[#allocation2 + $0x4] sm:$0xff]  ;;  %v3218_v29 = vld [vmem:[#allocation2 + $0xc] sm:$0xff]  ;;  %v2027_v56 = vld [vmem:[#allocation2 + $0x14] sm:$0xff] }
  0x28   : > { %2806 = vmatprep.subr.msk.mxu1 %vm423_vm2, %v2626_v11  ;;  %v1666_v31 = vld [vmem:[#allocation2 + $0xa] sm:$0xff]  ;;  %v2207_v1 = vld [vmem:[#allocation2 + $0x15] sm:$0xff] }
  0x29   : > { %v766_v37 = vld [vmem:[#allocation2 + $0x5] sm:$0xff]  ;;  %v767_v41 = vld [vmem:[#allocation2 + $0xd] sm:$0xff] }
  0x2a   : > { %v946_v48 = vld [vmem:[#allocation2 + $0x6] sm:$0xff]  ;;  %v947_v51 = vld [vmem:[#allocation2 + $0xe] sm:$0xff] }
  0x2b   : > { %v1126_v58 = vld [vmem:[#allocation2 + $0x7] sm:$0xff]  ;;  %v1127_v61 = vld [vmem:[#allocation2 + $0xf] sm:$0xff] }
  0xf1   : > { %v2745_v13 = vpop.f32.mrb[0].mxu0 }
  0xf2   : > { %410 = vst.msk [vmem:[#allocation3 + $0x10] sm:$0xff] %vm400_vm1, %v2745_v13  ;;  %v391_v14 = vpop.f32.mrb[1].mxu0 }
  0xf3   : > { %409 = vst.msk [vmem:[#allocation3 + $0x8] sm:$0xff] %vm400_vm1, %v391_v14 }
  0xf9   : > { %v1397_v18 = vld [vmem:[#allocation3 + $0x10] sm:$0xff] }
  0xfa   : > { %v414_v15 = vld [vmem:[#allocation3 + $0x3] sm:$0xff]  ;;  %v3185_v17 = vld [vmem:[#allocation3 + $0xb] sm:$0xff]  ;;  %v1937_v52 = vld [vmem:[#allocation3 + $0x13] sm:$0xff] }
  0xfb   : > { %v1396_v16 = vld [vmem:[#allocation3 + $0x8] sm:$0xff]  ;;  %2748 = vmatprep.mubr.msk.f32.mxu0 %vm400_vm1, %v414_v15  ;;  %v1577_v30 = vld [vmem:[#allocation3 + $0x11] sm:$0xff] }
  0xfc   : > { %2803 = vmatprep.mubr.msk.f32.mxu1 %vm400_vm1, %v1396_v16  ;;  %2749 = vmatmul.mubr.msk.f32.vlgmr.msra.gmra.mrb[2].mxu0 %vm400_vm1, %v3185_v17  ;;  %v1576_v26 = vld [vmem:[#allocation3 + $0x9] sm:$0xff]  ;;  %v1757_v42 = vld [vmem:[#allocation3 + $0x12] sm:$0xff] }
  0xfd   : > { %2804 = vmatmul.mubr.msk.f32.vlgmr.msra.gmra.mrb[0].mxu1 %vm400_vm1, %v1397_v18  ;;  %2752 = vmatpush3.msk.msra.mxu0 %vm423_vm2, %v413_v12  ;;  %v676_v32 = vld [vmem:[#allocation3 + $0x4] sm:$0xff]  ;;  %v677_v36 = vld [vmem:[#allocation3 + $0xc] sm:$0xff]  ;;  %v2117_v62 = vld [vmem:[#allocation3 + $0x14] sm:$0xff] }
  0xfe   : > { %2807 = vmatpush3.msk.msra.mxu1 %vm423_vm2, %v2626_v11  ;;  %2753 = vmatprep.mubr.msk.f32.mxu0 %vm400_vm1, %v411_v19  ;;  %v1756_v38 = vld [vmem:[#allocation3 + $0xa] sm:$0xff]  ;;  %v2297_v3 = vld [vmem:[#allocation3 + $0x15] sm:$0xff] }
  0xff   : > { %2808 = vmatprep.mubr.msk.f32.mxu1 %vm400_vm1, %v1486_v20  ;;  %2811 = vmatprep.subr.msk.mxu1 %vm423_vm2, %v2630_v21  ;;  %v856_v43 = vld [vmem:[#allocation3 + $0x5] sm:$0xff]  ;;  %v857_v47 = vld [vmem:[#allocation3 + $0xd] sm:$0xff] }
 0x100   : > { %2756 = vmatprep.subr.msk.mxu0 %vm423_vm2, %v2586_v22  ;;  %v1036_v53 = vld [vmem:[#allocation3 + $0x6] sm:$0xff]  ;;  %v1037_v57 = vld [vmem:[#allocation3 + $0xe] sm:$0xff] }
 0x101   : > { %v1216_v63 = vld [vmem:[#allocation3 + $0x7] sm:$0xff]  ;;  %v1217_v2 = vld [vmem:[#allocation3 + $0xf] sm:$0xff] }
 0x104   : > { %2754 = vmatmul.mubr.msk.f32.vlgmr.msra.gmra.mrb[2].mxu0 %vm400_vm1, %v412_v23 }
 0x105   : > { %2809 = vmatmul.mubr.msk.f32.vlgmr.msra.gmra.mrb[0].mxu1 %vm400_vm1, %v1487_v24  ;;  %2757 = vmatpush3.msk.msra.mxu0 %vm423_vm2, %v2586_v22 }
 0x106   : > { %2812 = vmatpush3.msk.msra.mxu1 %vm423_vm2, %v2630_v21  ;;  %2813 = vmatprep.mubr.msk.f32.mxu1 %vm400_vm1, %v1576_v26 }
 0x107   : > { %2758 = vmatprep.mubr.msk.f32.mxu0 %vm400_vm1, %v586_v25  ;;  %2816 = vmatprep.subr.msk.mxu1 %vm423_vm2, %v2634_v27 }
 0x108   : > { %2761 = vmatprep.subr.msk.mxu0 %vm423_vm2, %v2590_v28 }
 0x10c   : > { %2759 = vmatmul.mubr.msk.f32.vlgmr.msra.gmra.mrb[2].mxu0 %vm400_vm1, %v3218_v29 }
 0x10d   : > { %2814 = vmatmul.mubr.msk.f32.vlgmr.msra.gmra.mrb[0].mxu1 %vm400_vm1, %v1577_v30  ;;  %2763 = vmatprep.mubr.msk.f32.mxu0 %vm400_vm1, %v676_v32 }
 0x10e   : > { %2817 = vmatpush3.msk.msra.mxu1 %vm423_vm2, %v2634_v27  ;;  %2762 = vmatpush3.msk.msra.mxu0 %vm423_vm2, %v2590_v28 }
 0x10f   : > { %2818 = vmatprep.mubr.msk.f32.mxu1 %vm400_vm1, %v1666_v31  ;;  %2821 = vmatprep.subr.msk.mxu1 %vm423_vm2, %v2638_v33 }
 0x110   : > { %2766 = vmatprep.subr.msk.mxu0 %vm423_vm2, %v2594_v34 }
 0x114   : > { %2764 = vmatmul.mubr.msk.f32.vlgmr.msra.gmra.mrb[2].mxu0 %vm400_vm1, %v677_v36 }
 0x115   : > { %2819 = vmatmul.mubr.msk.f32.vlgmr.msra.gmra.mrb[0].mxu1 %vm400_vm1, %v1667_v35  ;;  %2767 = vmatpush3.msk.msra.mxu0 %vm423_vm2, %v2594_v34 }
 0x116   : > { %2822 = vmatpush3.msk.msra.mxu1 %vm423_vm2, %v2638_v33  ;;  %2823 = vmatprep.mubr.msk.f32.mxu1 %vm400_vm1, %v1756_v38 }
 0x117   : > { %2768 = vmatprep.mubr.msk.f32.mxu0 %vm400_vm1, %v766_v37  ;;  %2826 = vmatprep.subr.msk.mxu1 %vm423_vm2, %v2642_v39 }
 0x118   : > { %2771 = vmatprep.subr.msk.mxu0 %vm423_vm2, %v2598_v40 }
 0x11c   : > { %2769 = vmatmul.mubr.msk.f32.vlgmr.msra.gmra.mrb[2].mxu0 %vm400_vm1, %v767_v41 }
 0x11d   : > { %2824 = vmatmul.mubr.msk.f32.vlgmr.msra.gmra.mrb[0].mxu1 %vm400_vm1, %v1757_v42  ;;  %2773 = vmatprep.mubr.msk.f32.mxu0 %vm400_vm1, %v856_v43 }
 0x11e   : > { %2827 = vmatpush3.msk.msra.mxu1 %vm423_vm2, %v2642_v39  ;;  %2772 = vmatpush3.msk.msra.mxu0 %vm423_vm2, %v2598_v40 }
 0x11f   : > { %2828 = vmatprep.mubr.msk.f32.mxu1 %vm400_vm1, %v412_v23  ;;  %2831 = vmatprep.subr.msk.mxu1 %vm423_vm2, %v2646_v44 }
 0x120   : > { %2776 = vmatprep.subr.msk.mxu0 %vm423_vm2, %v2602_v45 }
 0x124   : > { %2774 = vmatmul.mubr.msk.f32.vlgmr.msra.gmra.mrb[2].mxu0 %vm400_vm1, %v857_v47 }
 0x125   : > { %2829 = vmatmul.mubr.msk.f32.vlgmr.msra.gmra.mrb[0].mxu1 %vm400_vm1, %v1847_v46  ;;  %2777 = vmatpush3.msk.msra.mxu0 %vm423_vm2, %v2602_v45 }
 0x126   : > { %2832 = vmatpush3.msk.msra.mxu1 %vm423_vm2, %v2646_v44  ;;  %2833 = vmatprep.mubr.msk.f32.mxu1 %vm400_vm1, %v3185_v17 }
 0x127   : > { %2778 = vmatprep.mubr.msk.f32.mxu0 %vm400_vm1, %v946_v48  ;;  %2836 = vmatprep.subr.msk.mxu1 %vm423_vm2, %v2650_v49 }
 0x128   : > { %2781 = vmatprep.subr.msk.mxu0 %vm423_vm2, %v2606_v50 }
 0x12c   : > { %2779 = vmatmul.mubr.msk.f32.vlgmr.msra.gmra.mrb[2].mxu0 %vm400_vm1, %v947_v51 }
 0x12d   : > { %2834 = vmatmul.mubr.msk.f32.vlgmr.msra.gmra.mrb[0].mxu1 %vm400_vm1, %v1937_v52  ;;  %2783 = vmatprep.mubr.msk.f32.mxu0 %vm400_vm1, %v1036_v53 }
 0x12e   : > { %2837 = vmatpush3.msk.msra.mxu1 %vm423_vm2, %v2650_v49  ;;  %2782 = vmatpush3.msk.msra.mxu0 %vm423_vm2, %v2606_v50 }
 0x12f   : > { %2838 = vmatprep.mubr.msk.f32.mxu1 %vm400_vm1, %v3218_v29  ;;  %2841 = vmatprep.subr.msk.mxu1 %vm423_vm2, %v2654_v54 }
 0x130   : > { %2786 = vmatprep.subr.msk.mxu0 %vm423_vm2, %v2610_v55 }
 0x134   : > { %2784 = vmatmul.mubr.msk.f32.vlgmr.msra.gmra.mrb[2].mxu0 %vm400_vm1, %v1037_v57 }
 0x135   : > { %2839 = vmatmul.mubr.msk.f32.vlgmr.msra.gmra.mrb[0].mxu1 %vm400_vm1, %v2027_v56  ;;  %2787 = vmatpush3.msk.msra.mxu0 %vm423_vm2, %v2610_v55 }
 0x136   : > { %2842 = vmatpush3.msk.msra.mxu1 %vm423_vm2, %v2654_v54  ;;  %2843 = vmatprep.mubr.msk.f32.mxu1 %vm400_vm1, %v677_v36 }
 0x137   : > { %2788 = vmatprep.mubr.msk.f32.mxu0 %vm400_vm1, %v1126_v58  ;;  %2846 = vmatprep.subr.msk.mxu1 %vm423_vm2, %v2658_v59 }
 0x138   : > { %2791 = vmatprep.subr.msk.mxu0 %vm423_vm2, %v2614_v60 }
 0x13c   : > { %2789 = vmatmul.mubr.msk.f32.vlgmr.msra.gmra.mrb[2].mxu0 %vm400_vm1, %v1127_v61 }
 0x13d   : > { %2844 = vmatmul.mubr.msk.f32.vlgmr.msra.gmra.mrb[0].mxu1 %vm400_vm1, %v2117_v62  ;;  %2793 = vmatprep.mubr.msk.f32.mxu0 %vm400_vm1, %v1216_v63 }
 0x13e   : > { %2847 = vmatpush3.msk.msra.mxu1 %vm423_vm2, %v2658_v59  ;;  %2792 = vmatpush3.msk.msra.mxu0 %vm423_vm2, %v2614_v60 }
 0x13f   : > { %2848 = vmatprep.mubr.msk.f32.mxu1 %vm400_vm1, %v767_v41  ;;  %2851 = vmatprep.subr.msk.mxu1 %vm423_vm2, %v2662_v0 }
 0x144   : > { %2794 = vmatmul.mubr.msk.f32.vlgmr.msra.gmra.mrb[2].mxu0 %vm400_vm1, %v1217_v2 }
 0x145   : > { %2849 = vmatmul.mubr.msk.f32.vlgmr.msra.gmra.mrb[0].mxu1 %vm400_vm1, %v2207_v1 }
 0x146   : > { %2852 = vmatpush3.msk.msra.mxu1 %vm423_vm2, %v2662_v0  ;;  %2853 = vmatprep.mubr.msk.f32.mxu1 %vm400_vm1, %v857_v47 }
 0x14d   : > { %2854 = vmatmul.mubr.msk.f32.vlgmr.msra.gmra.mrb[0].mxu1 %vm400_vm1, %v2297_v3 }
 0x217   : > { %v2795_v4 = vpop.f32.mrb[2].mxu0 }
 0x218   : > { %v1295_v5 = vpop.f32.mrb[3].mxu0 }
 0x220   : > { %v2855_v6 = vpop.f32.mrb[0].mxu1 }
 0x221   : > { %v2856_v7 = vadd.f32 %v2855_v6, %v2795_v4  ;;  %v2375_v8 = vpop.f32.mrb[1].mxu1 }
 0x222   : > { %v2857_v9 = vadd.f32 %v2375_v8, %v1295_v5 }
 0x223   : > { %2387 = vst.msk [vmem:[%s314_s29 + $0x8] sm:$0xff] %vm400_vm1, %v2856_v7  ;;  %v2389_v10 = vsel %vm400_vm1, %v2856_v7, 0.0  ;;  %v2400_v11 = vmul.f32 %v2856_v7, %v2856_v7 }
 0x224   : > { %2386 = vst.msk [vmem:[%s314_s29] sm:$0xff] %vm400_vm1, %v2857_v9  ;;  %v2388_v12 = vsel %vm400_vm1, %v2857_v9, 0.0  ;;  %v2399_v13 = vmul.f32 %v2857_v9, %v2857_v9  ;;  %s3040_s29 = smov [#allocation4]  }
 0x225   : > { %v2402_v14 = vsel %vm400_vm1, %v2400_v11, 0.0  ;;  %v2390_v15 = vadd.f32 %v2389_v10, %v2388_v12  ;;  %s2947_s16 = sshll.u32 %s3040_s29, 4  ;;  %s2948_s16 = int_to_ptr.vmem [resolvable:$false] %s2947_s16 }
 0x226   : > { %v2401_v16 = vsel %vm400_vm1, %v2399_v13, 0.0  ;;  %s2949_s18 = scalar_lea.vmem %s2948_s16, 32  ;;  %p2950_p0 = scmp.lt.s32.totalorder %s3346_s9, %s2948_s16 }
 0x227   : > { %v2391_v17 = vrot.slane %v2390_v15, 4  ;;  %v2403_v18 = vadd.f32 %v2402_v14, %v2401_v16  ;;  %p2951_p1 = scmp.lt.s32.totalorder %s2949_s18, %s2943_s23 }
 0x229   : > { %v2392_v19 = vadd.f32 %v2391_v17, %v2390_v15  ;;  %v2404_v20 = vrot.slane %v2403_v18, 4  ;;  %p2952_p2 = por %p2951_p1, %p2950_p0 }
 0x22b   : > { %v2393_v21 = vrot.slane %v2392_v19, 2  ;;  %v2405_v22 = vadd.f32 %v2404_v20, %v2403_v18  ;;  %p2953_p3 = pnand %p2952_p2, %p2946_p13 }
 0x22d   : > { %v2394_v23 = vadd.f32 %v2393_v21, %v2392_v19  ;;  %v2406_v24 = vrot.slane %v2405_v22, 2 }
 0x22f   : > { %v2395_v25 = vrot.slane %v2394_v23, 1  ;;  %v2407_v26 = vadd.f32 %v2406_v24, %v2405_v22 }
 0x231   : > { %v2396_v27 = vadd.f32 %v2395_v25, %v2394_v23  ;;  %v2408_v28 = vrot.slane %v2407_v26, 1 }
 0x233   : > { %2398 = vst.msk [vmem:[%s294_s8] sm:$0x1] %vm2397_vm3, %v2396_v27  ;;  %v2409_v29 = vadd.f32 %v2408_v28, %v2407_v26 }
 0x234   : > { %2956 = shalt.err (!%p2953_p3)
}
 0x235   : > { %s2957_s17 = scalar_lea.hbm %s3344_s19, 16  ;;  %s2961_s20 = scalar_lea.hbm %s3426_s6, 32 }
 0x236   : > { %p2958_p4 = scmp.ne.s32.totalorder %s3344_s19, %s2957_s17  ;;  %p2962_p9 = scmp.lt.u32.totalorder %s3344_s19, %s3426_s6 }
 0x237   : > { %p2963_p10 = scmp.lt.u32.totalorder %s2961_s20, %s2957_s17  ;;  %p2965_p12 = scmp.lt.u32.totalorder %s2957_s17, %s3344_s19 }
 0x238   : > { %p2959_p7 = pnand %p2958_p4, %p3120_p5 }
 0x239   : > { %p2964_p11 = por %p2963_p10, %p2962_p9 }
 0x23a   : > { %p2960_p8 = pneg %p2959_p7 }
 0x23b   : > { %p2966_p13 = por %p2965_p12, %p2964_p11 }
 0x23d   : > { %p2967_p0 = pnand %p2966_p13, %p2960_p8 }
 0x23f   : > { %2970 = shalt.err (!%p2967_p0)
}
 0x240   : > { %2898 = dma.vmem_to_hbm [thread:$0]  (%p3120_p5), %s3346_s9, 16, %s3344_s19, %s2417_s22   ;;  %2410 = vst.msk [vmem:[%s300_s13] sm:$0x1] %vm2397_vm3, %v2409_v29 }
 0x241   : > { %s2421_s23 = scalar_lea.sflag [#allocation7], %s3334_s15  ;;  %s2971_s18 = scalar_lea.vmem %s3354_s14, 16 }
 0x242   : > { %p2972_p1 = scmp.ne.s32.totalorder %s3354_s14, %s2971_s18  ;;  %s3041_s17 = smov [#allocation6]  }
 0x243   : > { %s2975_s8 = sshll.u32 %s3041_s17, 4  ;;  %s2976_s8 = int_to_ptr.vmem [resolvable:$false] %s2975_s8 }
 0x244   : > { %p2973_p2 = pnand %p2972_p1, %p3120_p5  ;;  %s2977_s28 = scalar_lea.vmem %s2976_s8, 32 }
 0x245   : > { %p2978_p4 = scmp.lt.s32.totalorder %s3354_s14, %s2976_s8  ;;  %p2979_p7 = scmp.lt.s32.totalorder %s2977_s28, %s2971_s18 }
 0x246   : > { %p2974_p3 = pneg %p2973_p2 }
 0x247   : > { %p2980_p8 = por %p2979_p7, %p2978_p4 }
 0x249   : > { %p2981_p9 = pnand %p2980_p8, %p2974_p3 }
 0x24b   : > { %2984 = shalt.err (!%p2981_p9)
}
 0x24c   : > { %s2985_s15 = scalar_lea.hbm %s3352_s21, 16  ;;  %s2989_s19 = scalar_lea.hbm %s3427_s7, 32 }
 0x24d   : > { %p2986_p10 = scmp.ne.s32.totalorder %s3352_s21, %s2985_s15  ;;  %p2990_p13 = scmp.lt.u32.totalorder %s3352_s21, %s3427_s7 }
 0x24e   : > { %p2991_p0 = scmp.lt.u32.totalorder %s2989_s19, %s2985_s15  ;;  %p2993_p2 = scmp.lt.u32.totalorder %s2985_s15, %s3352_s21 }
 0x24f   : > { %p2987_p11 = pnand %p2986_p10, %p3120_p5 }
 0x250   : > { %p2992_p1 = por %p2991_p0, %p2990_p13 }
 0x251   : > { %p2988_p12 = pneg %p2987_p11 }
 0x252   : > { %p2994_p3 = por %p2993_p2, %p2992_p1 }
 0x254   : > { %p2995_p4 = pnand %p2994_p3, %p2988_p12 }
 0x256   : > { %2998 = shalt.err (!%p2995_p4)
}
 0x257   : > { %2899 = dma.vmem_to_hbm [thread:$0]  (%p3120_p5), %s3354_s14, 16, %s3352_s21, %s2421_s23  }
 0x258 PF: > { %p2909_p7 = scmp.ge.s32.totalorder %s3037_s27, 2  ;;  %s2469_s29 = sand.u32 1, %s3025_s24  }
 0x259   : > { %s2470_s16 = scalar_lea.sflag [#allocation5], %s2469_s29 }
 0x25a   : > { %p2903_p8 = pnand %p2909_p7, %p3124_p6 }
 0x25c   : > { %3016 = dma.done.wait (!%p2903_p8), %s2470_s16, 16  }
 0x25d   : > { %3018 = vsyncadd (!%p2903_p8), %s2470_s16, 4294967280  ;;  %s2478_s18 = scalar_lea.sflag [#allocation7], %s2469_s29 }
 0x25e   : > { %3020 = dma.done.wait (!%p2903_p8), %s2478_s18, 16  }
 0x25f   : > { %3022 = vsyncadd (!%p2903_p8), %s2478_s18, 4294967280  ;;  %p21_p5 = scmp.ge.s32.totalorder %s3107_s30, 4   ;;  %s3430_s24 = smov %s3029_s25 }
 0x260   : > { %s3431_s25 = smov %s3033_s26  ;;  %s3432_s26 = smov %s3118_s10 }
 0x261   : > { %s3433_s27 = smov %s3107_s30  ;;  %23 = sbr.rel (!%p21_p5) target bundleno = 5 (0x5), region = 127 }
 0x268   :  { %2482 = vsyncpa [#allocation5], 1 }
 0x269   :  { %2484 = vsyncpa [#allocation5 + $0x1], 1 }
 0x26a   :  { %2485 = vsyncpa [#allocation7], 1 }
 0x26b   :  { %2487 = vsyncpa [#allocation7 + $0x1], 1 }

</bundles_post_ra>
